<compile_context>
chip_gen: v5e
topology: v5e:2x2
jax: 0.10.0
libtpu: 0.0.40
codegen_flags: <defaults>
</compile_context>

<pallas_src>
import functools

import jax
import jax.numpy as jnp
from jax.experimental import pallas as pl
from jax.experimental.pallas import tpu as pltpu


def _round_up(x, m):
    return -(-x // m) * m


def gcn_kernel(x_ref, w1l_ref, w1r_ref, w2_ref, out_ref, *, k, Wp, Cin):
    """One grid step = B images, each an L1-lane segment (L1 multiple of 128).

    x_ref : (1, Cp, B*L1)  rows 0..Cin-1: zero-padded image (Hp,Wp) flattened,
                           row Cin: mw mask, row Cin+1: mh mask, rest zero.
    w1l   : (Cout, k*Cp)   left (k,1) weights, bias folded on (tap0, row Cin)
    w1r   : (Cout, k*Cp)   right (1,k) weights, bias folded on (tap p, row Cin+1)
    w2    : (Cout, 2*k*Cout+1) fused stage-2 weights + bias column
    out   : (1, Cout, B*L1) stage-2 output on the per-image (H,Wp) grid
    """
    f32 = jnp.float32
    p = (k - 1) // 2
    x = x_ref[0]                                   # (Cp, n), n = B*L1
    Cp, n = x.shape
    Cout = w2_ref.shape[0]
    ext_h = (k - 1) * Wp                           # largest H-tap lane shift

    mw = x[Cin:Cin + 1, :]                         # (1, n) valid (H,Wp) lanes
    mh = x[Cin + 1:Cin + 2, :]                     # (1, n) valid (Hp,Wp) lanes

    # Zero-extended copy of x; every tap below is then a length-n lane slice.
    xe = jnp.concatenate(
        [jnp.zeros((Cp, p), f32), x, jnp.zeros((Cp, ext_h), f32)], axis=1)

    # ---- stage 1, left: (k,1) conv along H; tap t = shift by +t*Wp lanes -----
    a1l = jnp.concatenate(
        [xe[:, p + t * Wp: p + t * Wp + n] for t in range(k)], axis=0)   # (k*Cp, n)
    y1l = jnp.dot(w1l_ref[...], a1l, preferred_element_type=f32) * mw    # (Cout, n)

    # ---- stage 1, right: (1,k) conv along W; tap s = shift by (s-p) lanes ----
    a1r = jnp.concatenate(
        [xe[:, s: s + n] for s in range(k)], axis=0)                     # (k*Cp, n)
    y1r = jnp.dot(w1r_ref[...], a1r, preferred_element_type=f32) * mh    # (Cout, n)

    # ---- stage 2: both branches fused into one matmul (+ bias via mw row) ----
    y1l_e = jnp.concatenate(
        [jnp.zeros((Cout, p), f32), y1l, jnp.zeros((Cout, p), f32)], axis=1)
    y1r_e = jnp.concatenate([y1r, jnp.zeros((Cout, ext_h), f32)], axis=1)
    a2 = jnp.concatenate(
        [y1l_e[:, s: s + n] for s in range(k)]           # left (1,k) taps
        + [y1r_e[:, t * Wp: t * Wp + n] for t in range(k)]  # right (k,1) taps
        + [mw], axis=0)                                   # (2*k*Cout+1, n)
    out = jnp.dot(w2_ref[...], a2, preferred_element_type=f32)
    out_ref[0] = out.astype(out_ref.dtype)                # lane-dense store


def _pack_params(torch_params, k, Cp):
    """Pack PyTorch conv weights into the im2col layouts used by the kernel."""
    wl1, bl1, wl2, bl2, wr1, br1, wr2, br2 = torch_params
    Cout, Cin = wl1.shape[0], wl1.shape[1]
    p = (k - 1) // 2

    # stage-1 left: a1l row (t*Cp + c) = channel c shifted by t rows
    w1l = jnp.zeros((Cout, k, Cp), jnp.float32)
    w1l = w1l.at[:, :, :Cin].set(jnp.transpose(wl1[:, :, :, 0], (0, 2, 1)))
    w1l = w1l.at[:, 0, Cin].set(bl1.reshape(-1))      # bias rides the mw row (tap 0)
    w1l = w1l.reshape(Cout, k * Cp)

    # stage-1 right: a1r row (s*Cp + c) = channel c shifted by (s-p) columns
    w1r = jnp.zeros((Cout, k, Cp), jnp.float32)
    w1r = w1r.at[:, :, :Cin].set(jnp.transpose(wr1[:, :, 0, :], (0, 2, 1)))
    w1r = w1r.at[:, p, Cin + 1].set(br1.reshape(-1))  # bias rides the mh row (tap p)
    w1r = w1r.reshape(Cout, k * Cp)

    # fused stage-2: [left (1,k) taps | right (k,1) taps | bias column]
    w2l = jnp.transpose(wl2[:, :, 0, :], (0, 2, 1)).reshape(Cout, k * Cout)
    w2r = jnp.transpose(wr2[:, :, :, 0], (0, 2, 1)).reshape(Cout, k * Cout)
    b2 = (bl2 + br2).reshape(Cout, 1)
    w2 = jnp.concatenate([w2l, w2r, b2], axis=1)      # (Cout, 2*k*Cout + 1)
    return w1l, w1r, w2


def gcn_forward(x_nchw, torch_params, k, num_grid_steps=None):
    """x_nchw: (N, Cin, H, W) float32. Returns (N, Cout, H, W) float32.

    num_grid_steps: grid length G.  Default min(2, N): 2 parallel steps feed both
    v7x TensorCores; pass 1 on v5e/v6e to fold the whole batch into one step
    (batch flattened on lanes).  N=1 always uses a single step.
    """
    N, Cin, H, W = x_nchw.shape
    Cout = torch_params[0].shape[0]
    p = (k - 1) // 2
    Hp, Wp = H + 2 * p, W + 2 * p

    G = min(2, N) if num_grid_steps is None else max(1, min(int(num_grid_steps), N))
    B = -(-N // G)                                  # images per grid step
    Npad = G * B
    L1 = _round_up(Hp * Wp, 128)                    # per-image lane segment
    if L1 - Hp * Wp < p:                            # keep >= p zero lanes of tail
        L1 += 128
    Cp = max(8, _round_up(Cin + 2, 8))              # Cin + 2 mask rows, 8-aligned

    w1l, w1r, w2 = _pack_params(torch_params, k, Cp)

    # masks / folded-bias rows (per image segment):
    #   mw: 1 on valid (H,Wp)-grid lanes with a real W column, else 0
    #   mh: 1 on valid (Hp,Wp)-grid lanes with a real H row,    else 0
    q = jnp.arange(L1)
    mw = ((q < H * Wp) & ((q % Wp) >= p) & ((q % Wp) < p + W)).astype(jnp.float32)
    mh = ((q < Hp * Wp) & ((q // Wp) >= p) & ((q // Wp) < p + H)).astype(jnp.float32)

    # Build the (G, Cp, B*L1) channel-major, lane-segmented input (stays NCHW-ish,
    # no transposes of the big spatial data; all of this is tiny host/XLA work).
    xb = jnp.pad(x_nchw, ((0, Npad - N), (0, 0), (p, p), (p, p)))
    xb = xb.reshape(Npad, Cin, Hp * Wp)
    xb = jnp.pad(xb, ((0, 0), (0, 0), (0, L1 - Hp * Wp)))
    rows = jnp.broadcast_to(jnp.stack([mw, mh])[None], (Npad, 2, L1))
    zrows = jnp.zeros((Npad, Cp - Cin - 2, L1), jnp.float32)
    xb = jnp.concatenate([xb, rows, zrows], axis=1)               # (Npad, Cp, L1)
    xb = xb.reshape(G, B, Cp, L1).transpose(0, 2, 1, 3).reshape(G, Cp, B * L1)

    kern = functools.partial(gcn_kernel, k=k, Wp=Wp, Cin=Cin)
    out = pl.pallas_call(
        kern,
        out_shape=jax.ShapeDtypeStruct((G, Cout, B * L1), jnp.float32),
        grid=(G,),
        in_specs=[
            pl.BlockSpec((1, Cp, B * L1), lambda g: (g, 0, 0)),
            pl.BlockSpec(w1l.shape, lambda g: (0, 0)),
            pl.BlockSpec(w1r.shape, lambda g: (0, 0)),
            pl.BlockSpec(w2.shape, lambda g: (0, 0)),
        ],
        out_specs=pl.BlockSpec((1, Cout, B * L1), lambda g: (g, 0, 0)),
        compiler_params=pltpu.CompilerParams(dimension_semantics=("parallel",)),
    )(xb, w1l, w1r, w2)

    # Unpack lane segments and crop the W halo (kept in the wrapper so the
    # kernel's final store stays a single unmasked, 128-multiple-lane vst).
    out = out.reshape(G, Cout, B, L1).transpose(0, 2, 1, 3).reshape(Npad, Cout, L1)
    out = out[:N, :, :H * Wp].reshape(N, Cout, H, Wp)[:, :, :, p:p + W]
    return out


def init_params(key, cin, cout, k):
    """Deterministic synthetic params (PyTorch Conv2d-style uniform init)."""
    ks = jax.random.split(key, 8)

    def w(key, shape):                      # shape = (Cout, Cin, kh, kw)
        fan_in = shape[1] * shape[2] * shape[3]
        bound = 1.0 / (fan_in ** 0.5)
        return jax.random.uniform(key, shape, jnp.float32, -bound, bound)

    def b(key, n, fan_in):
        bound = 1.0 / (fan_in ** 0.5)
        return jax.random.uniform(key, (1, n), jnp.float32, -bound, bound)

    wl1 = w(ks[0], (cout, cin, k, 1));  bl1 = b(ks[1], cout, cin * k)
    wl2 = w(ks[2], (cout, cout, 1, k)); bl2 = b(ks[3], cout, cout * k)
    wr1 = w(ks[4], (cout, cin, 1, k));  br1 = b(ks[5], cout, cin * k)
    wr2 = w(ks[6], (cout, cout, k, 1)); br2 = b(ks[7], cout, cout * k)
    return (wl1, bl1, wl2, bl2, wr1, br1, wr2, br2)


def ref_gcn(x_nchw, torch_params, k):
    """Pure-JAX reference (cross-correlation, same as PyTorch Conv2d)."""
    wl1, bl1, wl2, bl2, wr1, br1, wr2, br2 = torch_params
    pad = (k - 1) // 2

    def conv(x, w, b, ph, pw):
        y = jax.lax.conv_general_dilated(
            x, w, (1, 1), [(ph, ph), (pw, pw)],
            dimension_numbers=('NCHW', 'OIHW', 'NCHW'))
        return y + b.reshape(1, -1, 1, 1)

    l = conv(conv(x_nchw, wl1, bl1, pad, 0), wl2, bl2, 0, pad)
    r = conv(conv(x_nchw, wr1, br1, 0, pad), wr2, br2, pad, 0)
    return l + r


if __name__ == "__main__":
    key = jax.random.PRNGKey(0)
    kx, kp = jax.random.split(key)

    N, Cin, H, W = 2, 4, 16, 16       # small, consistent with the module
    Cout, K = 8, 7                    # feature_out_num, odd GCN kernel size

    x = jax.random.normal(kx, (N, Cin, H, W), jnp.float32)
    torch_params = init_params(kp, Cin, Cout, K)
    ref = ref_gcn(x, torch_params, K)

    # Default path: grid=(2,), one image per "parallel" step (both v7x TCs).
    out = jax.block_until_ready(gcn_forward(x, torch_params, K))
    assert out.shape == (N, Cout, H, W), out.shape
    err = float(jnp.max(jnp.abs(out - ref)))
    assert err < 1e-4, f"max abs error {err}"

    # Single-step path (v5e/v6e-friendly): whole batch flattened onto lanes.
    out1 = jax.block_until_ready(gcn_forward(x, torch_params, K, num_grid_steps=1))
    err1 = float(jnp.max(jnp.abs(out1 - ref)))
    assert err1 < 1e-4, f"max abs error {err1}"

    print("KERNEL_OK")
</pallas_src>

<mosaic_0001>
module attributes {stable_mosaic.version = 11 : i64} {
  func.func @gcn_kernel(%arg0: i32, %arg1: memref<1x8x512xf32, #tpu.memory_space<vmem>>, %arg2: memref<8x56xf32, #tpu.memory_space<vmem>>, %arg3: memref<8x56xf32, #tpu.memory_space<vmem>>, %arg4: memref<8x113xf32, #tpu.memory_space<vmem>>, %arg5: memref<1x8x512xf32, #tpu.memory_space<vmem>>) attributes {dimension_semantics = [#tpu.dimension_semantics<parallel>], iteration_bounds = array<i64: 2>, scalar_prefetch = 0 : i64, scratch_operands = 0 : i64, tpu.core_type = #tpu.core_type<tc>, window_params = [{transform_indices = @transform_0, window_bounds = array<i64: 1, 8, 512>}, {pipeline_mode = #tpu.pipeline_mode<synchronous>, transform_indices = @transform_1, window_bounds = array<i64: 8, 56>}, {pipeline_mode = #tpu.pipeline_mode<synchronous>, transform_indices = @transform_2, window_bounds = array<i64: 8, 56>}, {pipeline_mode = #tpu.pipeline_mode<synchronous>, transform_indices = @transform_3, window_bounds = array<i64: 8, 113>}, {transform_indices = @transform_4, window_bounds = array<i64: 1, 8, 512>}]} {
    %c0 = arith.constant 0 : index
    %c0_0 = arith.constant 0 : index
    %c0_1 = arith.constant 0 : index
    %0 = vector.load %arg1[%c0, %c0_0, %c0_1] : memref<1x8x512xf32, #tpu.memory_space<vmem>>, vector<1x8x512xf32>
    %1 = vector.shape_cast %0 : vector<1x8x512xf32> to vector<8x512xf32>
    %2 = vector.extract_strided_slice %1 {offsets = [4, 0], sizes = [1, 512], strides = [1, 1]} : vector<8x512xf32> to vector<1x512xf32>
    %3 = vector.extract_strided_slice %1 {offsets = [5, 0], sizes = [1, 512], strides = [1, 1]} : vector<8x512xf32> to vector<1x512xf32>
    %cst = arith.constant 0.000000e+00 : f32
    %4 = vector.broadcast %cst : f32 to vector<8x3xf32>
    %cst_2 = arith.constant 0.000000e+00 : f32
    %5 = vector.broadcast %cst_2 : f32 to vector<8x132xf32>
    %6 = tpu.concatenate %4, %1, %5 in 1 : vector<8x3xf32>, vector<8x512xf32>, vector<8x132xf32> -> vector<8x647xf32>
    %7 = vector.extract_strided_slice %6 {offsets = [0, 3], sizes = [8, 512], strides = [1, 1]} : vector<8x647xf32> to vector<8x512xf32>
    %8 = vector.extract_strided_slice %6 {offsets = [0, 25], sizes = [8, 512], strides = [1, 1]} : vector<8x647xf32> to vector<8x512xf32>
    %9 = vector.extract_strided_slice %6 {offsets = [0, 47], sizes = [8, 512], strides = [1, 1]} : vector<8x647xf32> to vector<8x512xf32>
    %10 = vector.extract_strided_slice %6 {offsets = [0, 69], sizes = [8, 512], strides = [1, 1]} : vector<8x647xf32> to vector<8x512xf32>
    %11 = vector.extract_strided_slice %6 {offsets = [0, 91], sizes = [8, 512], strides = [1, 1]} : vector<8x647xf32> to vector<8x512xf32>
    %12 = vector.extract_strided_slice %6 {offsets = [0, 113], sizes = [8, 512], strides = [1, 1]} : vector<8x647xf32> to vector<8x512xf32>
    %13 = vector.extract_strided_slice %6 {offsets = [0, 135], sizes = [8, 512], strides = [1, 1]} : vector<8x647xf32> to vector<8x512xf32>
    %14 = tpu.concatenate %7, %8, %9, %10, %11, %12, %13 in 0 : vector<8x512xf32>, vector<8x512xf32>, vector<8x512xf32>, vector<8x512xf32>, vector<8x512xf32>, vector<8x512xf32>, vector<8x512xf32> -> vector<56x512xf32>
    %c0_3 = arith.constant 0 : index
    %c0_4 = arith.constant 0 : index
    %15 = vector.load %arg2[%c0_3, %c0_4] : memref<8x56xf32, #tpu.memory_space<vmem>>, vector<8x56xf32>
    %cst_5 = arith.constant dense<0.000000e+00> : vector<8x512xf32>
    %16 = tpu.matmul %15, %14, %cst_5 {dimension_numbers = #tpu.dot_dimension_numbers<[1], [0], [0], [1], [0, 0, 1, 1], [], []>} : vector<8x56xf32>, vector<56x512xf32>, vector<8x512xf32> -> vector<8x512xf32>
    %17 = vector.broadcast %2 : vector<1x512xf32> to vector<8x512xf32>
    %18 = arith.mulf %16, %17 : vector<8x512xf32>
    %19 = vector.extract_strided_slice %6 {offsets = [0, 0], sizes = [8, 512], strides = [1, 1]} : vector<8x647xf32> to vector<8x512xf32>
    %20 = vector.extract_strided_slice %6 {offsets = [0, 1], sizes = [8, 512], strides = [1, 1]} : vector<8x647xf32> to vector<8x512xf32>
    %21 = vector.extract_strided_slice %6 {offsets = [0, 2], sizes = [8, 512], strides = [1, 1]} : vector<8x647xf32> to vector<8x512xf32>
    %22 = vector.extract_strided_slice %6 {offsets = [0, 3], sizes = [8, 512], strides = [1, 1]} : vector<8x647xf32> to vector<8x512xf32>
    %23 = vector.extract_strided_slice %6 {offsets = [0, 4], sizes = [8, 512], strides = [1, 1]} : vector<8x647xf32> to vector<8x512xf32>
    %24 = vector.extract_strided_slice %6 {offsets = [0, 5], sizes = [8, 512], strides = [1, 1]} : vector<8x647xf32> to vector<8x512xf32>
    %25 = vector.extract_strided_slice %6 {offsets = [0, 6], sizes = [8, 512], strides = [1, 1]} : vector<8x647xf32> to vector<8x512xf32>
    %26 = tpu.concatenate %19, %20, %21, %22, %23, %24, %25 in 0 : vector<8x512xf32>, vector<8x512xf32>, vector<8x512xf32>, vector<8x512xf32>, vector<8x512xf32>, vector<8x512xf32>, vector<8x512xf32> -> vector<56x512xf32>
    %c0_6 = arith.constant 0 : index
    %c0_7 = arith.constant 0 : index
    %27 = vector.load %arg3[%c0_6, %c0_7] : memref<8x56xf32, #tpu.memory_space<vmem>>, vector<8x56xf32>
    %cst_8 = arith.constant dense<0.000000e+00> : vector<8x512xf32>
    %28 = tpu.matmul %27, %26, %cst_8 {dimension_numbers = #tpu.dot_dimension_numbers<[1], [0], [0], [1], [0, 0, 1, 1], [], []>} : vector<8x56xf32>, vector<56x512xf32>, vector<8x512xf32> -> vector<8x512xf32>
    %29 = vector.broadcast %3 : vector<1x512xf32> to vector<8x512xf32>
    %30 = arith.mulf %28, %29 : vector<8x512xf32>
    %cst_9 = arith.constant 0.000000e+00 : f32
    %31 = vector.broadcast %cst_9 : f32 to vector<8x3xf32>
    %cst_10 = arith.constant 0.000000e+00 : f32
    %32 = vector.broadcast %cst_10 : f32 to vector<8x3xf32>
    %33 = tpu.concatenate %31, %18, %32 in 1 : vector<8x3xf32>, vector<8x512xf32>, vector<8x3xf32> -> vector<8x518xf32>
    %cst_11 = arith.constant 0.000000e+00 : f32
    %34 = vector.broadcast %cst_11 : f32 to vector<8x132xf32>
    %35 = tpu.concatenate %30, %34 in 1 : vector<8x512xf32>, vector<8x132xf32> -> vector<8x644xf32>
    %36 = vector.extract_strided_slice %33 {offsets = [0, 0], sizes = [8, 512], strides = [1, 1]} : vector<8x518xf32> to vector<8x512xf32>
    %37 = vector.extract_strided_slice %33 {offsets = [0, 1], sizes = [8, 512], strides = [1, 1]} : vector<8x518xf32> to vector<8x512xf32>
    %38 = vector.extract_strided_slice %33 {offsets = [0, 2], sizes = [8, 512], strides = [1, 1]} : vector<8x518xf32> to vector<8x512xf32>
    %39 = vector.extract_strided_slice %33 {offsets = [0, 3], sizes = [8, 512], strides = [1, 1]} : vector<8x518xf32> to vector<8x512xf32>
    %40 = vector.extract_strided_slice %33 {offsets = [0, 4], sizes = [8, 512], strides = [1, 1]} : vector<8x518xf32> to vector<8x512xf32>
    %41 = vector.extract_strided_slice %33 {offsets = [0, 5], sizes = [8, 512], strides = [1, 1]} : vector<8x518xf32> to vector<8x512xf32>
    %42 = vector.extract_strided_slice %33 {offsets = [0, 6], sizes = [8, 512], strides = [1, 1]} : vector<8x518xf32> to vector<8x512xf32>
    %43 = vector.extract_strided_slice %35 {offsets = [0, 0], sizes = [8, 512], strides = [1, 1]} : vector<8x644xf32> to vector<8x512xf32>
    %44 = vector.extract_strided_slice %35 {offsets = [0, 22], sizes = [8, 512], strides = [1, 1]} : vector<8x644xf32> to vector<8x512xf32>
    %45 = vector.extract_strided_slice %35 {offsets = [0, 44], sizes = [8, 512], strides = [1, 1]} : vector<8x644xf32> to vector<8x512xf32>
    %46 = vector.extract_strided_slice %35 {offsets = [0, 66], sizes = [8, 512], strides = [1, 1]} : vector<8x644xf32> to vector<8x512xf32>
    %47 = vector.extract_strided_slice %35 {offsets = [0, 88], sizes = [8, 512], strides = [1, 1]} : vector<8x644xf32> to vector<8x512xf32>
    %48 = vector.extract_strided_slice %35 {offsets = [0, 110], sizes = [8, 512], strides = [1, 1]} : vector<8x644xf32> to vector<8x512xf32>
    %49 = vector.extract_strided_slice %35 {offsets = [0, 132], sizes = [8, 512], strides = [1, 1]} : vector<8x644xf32> to vector<8x512xf32>
    %50 = tpu.concatenate %36, %37, %38, %39, %40, %41, %42, %43, %44, %45, %46, %47, %48, %49, %2 in 0 : vector<8x512xf32>, vector<8x512xf32>, vector<8x512xf32>, vector<8x512xf32>, vector<8x512xf32>, vector<8x512xf32>, vector<8x512xf32>, vector<8x512xf32>, vector<8x512xf32>, vector<8x512xf32>, vector<8x512xf32>, vector<8x512xf32>, vector<8x512xf32>, vector<8x512xf32>, vector<1x512xf32> -> vector<113x512xf32>
    %c0_12 = arith.constant 0 : index
    %c0_13 = arith.constant 0 : index
    %51 = vector.load %arg4[%c0_12, %c0_13] : memref<8x113xf32, #tpu.memory_space<vmem>>, vector<8x113xf32>
    %cst_14 = arith.constant dense<0.000000e+00> : vector<8x512xf32>
    %52 = tpu.matmul %51, %50, %cst_14 {dimension_numbers = #tpu.dot_dimension_numbers<[1], [0], [0], [1], [0, 0, 1, 1], [], []>} : vector<8x113xf32>, vector<113x512xf32>, vector<8x512xf32> -> vector<8x512xf32>
    %c0_15 = arith.constant 0 : index
    %c0_16 = arith.constant 0 : index
    %c0_17 = arith.constant 0 : index
    %53 = vector.load %arg5[%c0_15, %c0_16, %c0_17] : memref<1x8x512xf32, #tpu.memory_space<vmem>>, vector<1x8x512xf32>
    %54 = vector.shape_cast %53 : vector<1x8x512xf32> to vector<8x512xf32>
    %55 = vector.shape_cast %52 : vector<8x512xf32> to vector<1x8x512xf32>
    tpu.vector_store %arg5[%c0_15, %c0_16, %c0_17], %55 {strides = array<i32>} : memref<1x8x512xf32, #tpu.memory_space<vmem>>, vector<1x8x512xf32>,
    return
  }
  func.func @transform_0(%arg0: i32) -> (i32, i32, i32) {
    %c0_i32 = arith.constant 0 : i32
    %c0_i32_0 = arith.constant 0 : i32
    %c0_i32_1 = arith.constant 0 : i32
    return %arg0, %c0_i32, %c0_i32_0 : i32, i32, i32
  }
  func.func @transform_1(%arg0: i32) -> (i32, i32) {
    %c0_i32 = arith.constant 0 : i32
    %c0_i32_0 = arith.constant 0 : i32
    %c0_i32_1 = arith.constant 0 : i32
    return %c0_i32, %c0_i32_0 : i32, i32
  }
  func.func @transform_2(%arg0: i32) -> (i32, i32) {
    %c0_i32 = arith.constant 0 : i32
    %c0_i32_0 = arith.constant 0 : i32
    %c0_i32_1 = arith.constant 0 : i32
    return %c0_i32, %c0_i32_0 : i32, i32
  }
  func.func @transform_3(%arg0: i32) -> (i32, i32) {
    %c0_i32 = arith.constant 0 : i32
    %c0_i32_0 = arith.constant 0 : i32
    %c0_i32_1 = arith.constant 0 : i32
    return %c0_i32, %c0_i32_0 : i32, i32
  }
  func.func @transform_4(%arg0: i32) -> (i32, i32, i32) {
    %c0_i32 = arith.constant 0 : i32
    %c0_i32_0 = arith.constant 0 : i32
    %c0_i32_1 = arith.constant 0 : i32
    return %arg0, %c0_i32, %c0_i32_0 : i32, i32, i32
  }
}

</mosaic_0001>

<bundles_post_ra>
// kernel: tpu_custom_call.1
= control target key start
LH: loop header
LB: loop body
LE: loop exit
PB: predicated region body
PF: predicated region fallthrough
CT: control target
= control target key end

     0   :  { %9 = vsyncpa [#allocation3], 0  ;;  %s2597_s0 = inlined_call_operand.hbm [shape: f32[2,8,512], index: 0, kind: input, shape index: {}]   ;;  %s2598_s1 = inlined_call_operand.hbm [shape: f32[8,56], index: 1, kind: input, shape index: {}]   ;;  %s2599_s2 = inlined_call_operand.hbm [shape: f32[8,56], index: 2, kind: input, shape index: {}]   ;;  %s2600_s3 = inlined_call_operand.hbm [shape: f32[8,113], index: 3, kind: input, shape index: {}]   ;;  %s2601_s4 = inlined_call_operand.hbm [shape: f32[2,8,512], index: 4, kind: output, shape index: {}]  }
   0x1   :  { %11 = vsyncpa [#allocation3 + $0x1], 0 }
   0x2   :  { %12 = vsyncpa [#allocation6], 0 }
   0x3   :  { %13 = vsyncpa [#allocation9], 0 }
   0x4   :  { %14 = vsyncpa [#allocation4], 0 }
   0x5   :  { %16 = vsyncpa [#allocation4 + $0x1], 0  ;;  %s1916_s15 = smov 0   ;;  %s1918_s16 = smov 0  }
   0x6   :  { %s1920_s17 = smov 0   ;;  %s1922_s18 = smov 0  }
   0x7 LB: > { %s1937_s19 = sadd.s32 4294967295, %s1873_s18   ;;  %s1232_s20 = sadd.s32 4294967294, %s1873_s18   ;;  %s1873_s18 = sphi %s1922_s18, %s2613_s18   ;;  %s1869_s17 = sphi %s1920_s17, %s2612_s17   ;;  %s1865_s16 = sphi %s1918_s16, %s2611_s16   ;;  %s1861_s15 = sphi %s1916_s15, %s2610_s15  }
   0x8   : > { %p42_p0 = scmp.ne.s32.totalorder %s1865_s16, %s1861_s15  ;;  %p43_p1 = scmp.eq.s32.totalorder %s1937_s19, 0 }
   0x9   : > { %p129_p2 = scmp.eq.s32.totalorder %s1937_s19, 1  ;;  %p135_p3 = scmp.eq.s32.totalorder %s1232_s20, 1 }
   0xa   : > { %p1946_p4 = por %p43_p1, %p42_p0  ;;  %p1233_p5 = scmp.ge.s32.totalorder %s1873_s18, 1 }
   0xb   : > { %p1951_p6 = por %p135_p3, %p42_p0  ;;  %p142_p7 = scmp.lt.s32.totalorder %s1873_s18, 3 }
   0xc   : > { %s154_s25 = sshll.u32 %s2598_s1, 4  ;;  %s1875_s27 = smov [#allocation5]   ;;  %s155_s25 = int_to_ptr.hbm [resolvable:$true] %s154_s25 }
   0xd   : > { %p1959_p8 = pnand %p1233_p5, %p142_p7  ;;  %s156_s28 = sshll.u32 %s1875_s27, 4  ;;  %s157_s28 = int_to_ptr.vmem [resolvable:$true] %s156_s28 }
   0xe   : > { %s166_s5 = sshll.u32 %s2599_s2, 4  ;;  %s178_s8 = sshll.u32 %s2600_s3, 4  ;;  %s167_s5 = int_to_ptr.hbm [resolvable:$true] %s166_s5  ;;  %s179_s8 = int_to_ptr.hbm [resolvable:$true] %s178_s8 }
   0xf   : > { %p1290_p10 = pneg %p1959_p8  ;;  %s1876_s9 = smov [#allocation7]  }
  0x10   : > { %s168_s10 = sshll.u32 %s1876_s9, 4  ;;  %s1877_s11 = smov [#allocation8]   ;;  %s169_s10 = int_to_ptr.vmem [resolvable:$true] %s168_s10 }
  0x11   : > { %p1291_p11 = pnand %p1290_p10, %p43_p1  ;;  %s180_s12 = sshll.u32 %s1877_s11, 4  ;;  %s181_s12 = int_to_ptr.vmem [resolvable:$true] %s180_s12 }
  0x12   : > { %s1975_s13 = sadd.s32 1, %s1873_s18   ;;  %s29_s20 = sadd.s32 1, %s1869_s17 }
  0x13   : > { %1293 = dma.hbm_to_vmem [thread:$0]  (!%p1291_p11), %s155_s25, 128, %s157_s28, [#allocation6]  }
  0x14   : > { %1296 = dma.hbm_to_vmem [thread:$0]  (!%p1291_p11), %s167_s5, 128, %s169_s10, [#allocation6]  }
  0x15   : > { %1299 = dma.hbm_to_vmem [thread:$0]  (!%p1291_p11), %s179_s8, 128, %s181_s12, [#allocation9]  }
  0x16   : > { %s26_s14 = ssub.s32 %s1873_s18, %s1975_s13  ;;  %p36_p13 = scmp.ne.s32.totalorder %s1869_s17, %s1865_s16 }
  0x17   : > { %p27_p12 = scmp.eq.s32.totalorder %s26_s14, 0  ;;  %p37_p0 = scmp.eq.s32.totalorder %s1873_s18, 0 }
  0x18   : > { %p1988_p3 = por %p129_p2, %p36_p13  ;;  %p1311_p5 = scmp.lt.s32.totalorder %s1873_s18, 2 }
  0x19   : > { %s1984_s23 = scalar_select %p27_p12, %s1869_s17, %s29_s20  }
  0x1a   : > { %s191_s25 = sand.u32 1, %s1869_s17   ;;  %s1272_s27 = sshll.u32 %s1873_s18, 5 }
  0x1b   : > { %p38_p7 = por %p37_p0, %p36_p13  ;;  %s1238_s28 = sshll.u32 %s191_s25, 5 }
  0x1c   : > { %s200_s5 = scalar_lea.hbm %s2597_s0, %s1272_s27  ;;  %s195_s7 = scalar_lea.vmem [#allocation2], %s1238_s28 }
  0x1d   : > { %s202_s6 = sshll.u32 %s200_s5, 4  ;;  %s204_s8 = sshll.u32 %s195_s7, 4  ;;  %s203_s6 = int_to_ptr.hbm [resolvable:$true] %s202_s6  ;;  %s205_s8 = int_to_ptr.vmem [resolvable:$true] %s204_s8 }
  0x1e   : > { %p1998_p10 = pnand %p1311_p5, %p38_p7  ;;  %s192_s10 = scalar_lea.sflag [#allocation3], %s191_s25 }
  0x1f   : > { %s1769_s11 = sshra.s32 %s203_s6, 4  ;;  %s1776_s27 = scalar_lea.hbm %s2597_s0, 64  ;;  %s1770_s11 = int_to_ptr.hbm [resolvable:$true] %s1769_s11 }
  0x20   : > { %s1771_s12 = scalar_lea.hbm %s1770_s11, 32  ;;  %p1773_p11 = pneg %p1998_p10 }
  0x21   : > { %p1772_p2 = scmp.ne.s32.totalorder %s1770_s11, %s1771_s12  ;;  %p1777_p0 = scmp.lt.s32.totalorder %s1770_s11, %s2597_s0 }
  0x22   : > { %p1778_p5 = scmp.lt.s32.totalorder %s1776_s27, %s1771_s12 }
  0x23   : > { %p1774_p12 = pnand %p1773_p11, %p1772_p2 }
  0x24   : > { %p1779_p7 = por %p1778_p5, %p1777_p0 }
  0x25   : > { %p1775_p13 = pneg %p1774_p12 }
  0x27   : > { %p1780_p9 = pnand %p1779_p7, %p1775_p13 }
  0x29   : > { %1783 = shalt.err (!%p1780_p9)
}
  0x2a   : > { %1303 = dma.hbm_to_vmem [thread:$0]  (!%p1998_p10), %s203_s6, 512, %s205_s8, %s192_s10  }
  0x2b   : > { %213 = sbr.rel (%p1959_p8) target bundleno = 1008 (0x3f0), region = 36  ;;  %s2015_s25 = sand.u32 (!%p1959_p8), 1, %s1865_s16  }
  0x2c   : > { %s1242_s30 = sshll.u32 (!%p1959_p8), %s2015_s25, 5  ;;  %s216_s5 = scalar_lea.sflag (!%p1959_p8), [#allocation3], %s2015_s25 }
  0x2d   : > { %s219_s7 = scalar_lea.vmem (!%p1959_p8), [#allocation2], %s1242_s30 }
  0x30   : > { %1844 = dma.done.wait (%p1946_p4), %s216_s5, 512  }
  0x31   : > { %1846 = vsyncadd (%p1946_p4), %s216_s5, 4294966784 }
  0x32   : > { %1848 = dma.done.wait (%p43_p1), [#allocation6], 256  }
  0x33   : > { %1850 = vsyncadd (%p43_p1), [#allocation6], 4294967040 }
  0x34   : > { %1852 = dma.done.wait (%p43_p1), [#allocation9], 128  }
  0x35   : > { %1854 = vsyncadd (%p43_p1), [#allocation9], 4294967168  ;;  %v2033_v0 = vld [vmem:[%s219_s7 + $0x10] sm:$0xff]  ;;  %v2035_v1 = vld [vmem:[%s219_s7 + $0x18] sm:$0xff]  ;;  %s1878_s21 = smov 3   ;;  %vm276_vm0 = vcmask 23552  }
  0x36   : > { %v1364_v2 = vpack.i.bf16 %v2035_v1, %v2033_v0  ;;  %v2039_v3 = vld [vmem:[%s219_s7] sm:$0xff]  ;;  %v2044_v4 = vld [vmem:[%s219_s7 + $0x8] sm:$0xff]  ;;  %s1879_s26 = smov 124   ;;  %v1880_v15 = vmov 0.0   ;;  %s1881_s6 = smov 18   ;;  %vm359_vm1 = vcmask 146432   ;;  %vm2343_vm14 = vmneg %vm276_vm0 }
  0x37   : > { %268 = vrot.lane.b32.xlu1 %v2039_v3, %s1878_s21  ;;  %s1882_s8 = smov 40   ;;  %s1883_s9 = smov 62   ;;  %vm375_vm2 = vcmask 1014784   ;;  %vm344_vm3 = vcmask 326656   ;;  %vm329_vm4 = vcmask 506880   ;;  %vm314_vm5 = vcmask 687104  }
  0x38   : > { %1365 = vrot.lane.b32.xlu0 %v1364_v2, %s1878_s21  ;;  %s1884_s10 = smov 84   ;;  %s1885_s11 = smov 106   ;;  %vm299_vm6 = vcmask 867328   ;;  %vm451_vm7 = vcmask 1022976   ;;  %vm674_vm8 = vcmask 998400   ;;  %vm655_vm9 = vcmask 1006592  }
  0x39   : > { %s1886_s12 = smov 122   ;;  %s1887_s14 = smov 123   ;;  %vm508_vm10 = vcmask 457728   ;;  %vm629_vm11 = vcmask 1031168   ;;  %vm610_vm12 = vcmask 1039360   ;;  %vm1023_vm13 = vcmask 1040384  }
  0x3a   : > { %s1888_s20 = smov 125   ;;  %s1889_s27 = smov 127   ;;  %vm1019_vm15 = vcmask 924672  }
  0x3b   : > { %s1890_s28 = smov 126   ;;  %s1273_s29 = sshll.u32 %s1937_s19, 5 }
  0x3c   : > { %s1117_s19 = scalar_lea.sflag [#allocation4], %s2015_s25 }
  0x40   : > { %270 = vrot.lane.b32.xlu0 %v2044_v4, %s1878_s21 }
  0xa9   : > { %v2057_v11 = vpop.permute.xlu1 %268 }
  0xaa   : > { %v1366_v5 = vpop.permute.xlu0 %1365  ;;  %v2085_v19 = vsel %vm276_vm0, 0.0, %v2057_v11 }
  0xab   : > { %v1368_v6 = vunpack.i.h.bf16 %v1366_v5  ;;  %v1367_v7 = vunpack.i.l.bf16 %v1366_v5 }
  0xad   : > { %v286_v8 = vsel %vm276_vm0, %v1368_v6, 0.0  ;;  %v2050_v9 = vsel %vm276_vm0, %v1367_v7, %v1368_v6 }
  0xae   : > { %v2053_v10 = vpack.i.bf16 %v286_v8, %v2050_v9 }
  0xb0   : > { %1370 = vrot.lane.b32.xlu1 %v2053_v10, %s1879_s26 }
  0xb2   : > { %v271_v12 = vpop.permute.xlu0 %270 }
  0xb3   : > { %v2060_v13 = vsel %vm276_vm0, %v271_v12, %v1367_v7  ;;  %v2064_v14 = vsel %vm276_vm0, %v2057_v11, %v271_v12 }
  0xb4   : > { %v1374_v16 = vpack.i.bf16 %v2060_v13, %v1880_v15  ;;  %v1384_v17 = vpack.i.bf16 %v2064_v14, %v286_v8  ;;  %v1389_v18 = vpack.i.bf16 %v2050_v9, %v2060_v13 }
  0xb6   : > { %1375 = vrot.lane.b32.xlu2 %v1374_v16, %s1879_s26  ;;  %1385 = vrot.lane.b32.xlu0 %v1384_v17, %s1881_s6 }
  0xb8   : > { %1390 = vrot.lane.b32.xlu1 %v1389_v18, %s1882_s8 }
  0xbe   : > { %1380 = vrot.lane.b32.xlu2 %v1389_v18, %s1881_s6  ;;  %1400 = vrot.lane.b32.xlu0 %v1389_v18, %s1883_s9 }
  0xc0   : > { %1405 = vrot.lane.b32.xlu1 %v1384_v17, %s1883_s9 }
  0xc6   : > { %1395 = vrot.lane.b32.xlu2 %v1384_v17, %s1882_s8  ;;  %1415 = vrot.lane.b32.xlu0 %v1384_v17, %s1884_s10 }
  0xc8   : > { %1420 = vrot.lane.b32.xlu1 %v1389_v18, %s1885_s11 }
  0xce   : > { %1410 = vrot.lane.b32.xlu2 %v1389_v18, %s1884_s10  ;;  %365 = vrot.lane.b32.xlu0 %v2064_v14, %s1879_s26 }
  0xd0   : > { %349 = vrot.lane.b32.xlu1 %v2085_v19, %s1881_s6 }
  0xd6   : > { %1425 = vrot.lane.b32.xlu2 %v1384_v17, %s1885_s11  ;;  %319 = vrot.lane.b32.xlu0 %v2085_v19, %s1883_s9 }
  0xd8   : > { %304 = vrot.lane.b32.xlu1 %v2085_v19, %s1884_s10 }
  0xde   : > { %334 = vrot.lane.b32.xlu2 %v2085_v19, %s1882_s8  ;;  %1435 = vrot.lane.b32.xlu0 %v2053_v10, %s1886_s12 }
  0xe0   : > { %1440 = vrot.lane.b32.xlu1 %v2053_v10, %s1887_s14 }
  0xe6   : > { %289 = vrot.lane.b32.xlu2 %v2085_v19, %s1885_s11 }
  0xee   : > { %1430 = vrot.lane.b32.xlu2 %v2053_v10, %s1888_s20 }
  0xf6   : > { %381 = vrot.lane.b32.xlu2 %v2085_v19, %s1888_s20 }
 0x110   : > { %v2106_v20 = vpop.permute.xlu2 %1375 }
 0x111   : > { %v2113_v24 = vunpack.i.l.bf16 %v2106_v20  ;;  %v1378_v52 = vunpack.i.h.bf16 %v2106_v20 }
 0x118   : > { %v2108_v21 = vpop.permute.xlu2 %1380 }
 0x119   : > { %v1383_v22 = vunpack.i.h.bf16 %v2108_v21  ;;  %v1382_v23 = vunpack.i.l.bf16 %v2108_v21 }
 0x11b   : > { %v362_v25 = vsel %vm359_vm1, %v1382_v23, %v1383_v22 }
 0x11c   : > { %v1449_v26 = vpack.i.bf16 %v362_v25, %v2113_v24 }
 0x11e   : > { %1450 = vrot.lane.b32.xlu1 %v1449_v26, %s1888_s20 }
 0x120   : > { %v2118_v27 = vpop.permute.xlu2 %1395 }
 0x121   : > { %v1397_v37 = vunpack.i.l.bf16 %v2118_v27  ;;  %v1398_v25 = vunpack.i.h.bf16 %v2118_v27 }
 0x122   : > { %v1371_v28 = vpop.permute.xlu1 %1370 }
 0x123   : > { %v1373_v29 = vunpack.i.h.bf16 %v1371_v28  ;;  %v1372_v30 = vunpack.i.l.bf16 %v1371_v28 }
 0x125   : > { %v2121_v31 = vsel %vm375_vm2, %v1372_v30, %v1373_v29  ;;  %v379_v32 = vsel %vm375_vm2, %v1373_v29, %v2113_v24  ;;  %v2145_v58 = vsel %vm375_vm2, %v1378_v52, %v1372_v30 }
 0x126   : > { %v1444_v33 = vpack.i.bf16 %v379_v32, %v2121_v31 }
 0x128   : > { %v2126_v34 = vpop.permute.xlu0 %1385  ;;  %1445 = vrot.lane.b32.xlu0 %v1444_v33, %s1888_s20  ;;  %v2132_v41 = vpop.permute.xlu2 %1410 }
 0x129   : > { %v1387_v35 = vunpack.i.l.bf16 %v2126_v34  ;;  %v1413_v46 = vunpack.i.h.bf16 %v2132_v41  ;;  %v1412_v47 = vunpack.i.l.bf16 %v2132_v41  ;;  %v1388_v63 = vunpack.i.h.bf16 %v2126_v34 }
 0x12a   : > { %v1391_v36 = vpop.permute.xlu1 %1390 }
 0x12b   : > { %v363_v38 = vsel %vm359_vm1, %v1383_v22, %v1387_v35  ;;  %v1393_v39 = vunpack.i.h.bf16 %v1391_v36  ;;  %v1392_v40 = vunpack.i.l.bf16 %v1391_v36  ;;  %v317_v55 = vsel %vm314_vm5, %v1412_v47, %v1413_v46 }
 0x12c   : > { %v1454_v42 = vpack.i.bf16 %v1387_v35, %v363_v38  ;;  %v1474_v60 = vpack.i.bf16 %v317_v55, %v2145_v58  ;;  %v361_v18 = vsel %vm359_vm1, %v1388_v63, %v1382_v23 }
 0x12d   : > { %v347_v43 = vsel %vm344_vm3, %v1392_v40, %v1393_v39  ;;  %v348_v44 = vsel %vm344_vm3, %v1393_v39, %v1397_v37  ;;  %v346_v30 = vsel %vm344_vm3, %v1398_v25, %v1392_v40 }
 0x12e   : > { %1455 = vrot.lane.b32.xlu2 %v1454_v42, %s1888_s20  ;;  %v1459_v45 = vpack.i.bf16 %v348_v44, %v347_v43  ;;  %v1494_v27 = vpack.i.bf16 %v2060_v13, %v346_v30 }
 0x130   : > { %v1401_v48 = vpop.permute.xlu0 %1400  ;;  %1460 = vrot.lane.b32.xlu0 %v1459_v45, %s1888_s20  ;;  %v1426_v61 = vpop.permute.xlu2 %1425 }
 0x131   : > { %v1403_v49 = vunpack.i.h.bf16 %v1401_v48  ;;  %v1402_v50 = vunpack.i.l.bf16 %v1401_v48  ;;  %v1427_v6 = vunpack.i.l.bf16 %v1426_v61  ;;  %v1428_v28 = vunpack.i.h.bf16 %v1426_v61 }
 0x132   : > { %v1406_v51 = vpop.permute.xlu1 %1405  ;;  %v1514_v48 = vpack.i.bf16 %v2064_v14, %v2060_v13 }
 0x133   : > { %v1407_v53 = vunpack.i.l.bf16 %v1406_v51  ;;  %v332_v54 = vsel %vm329_vm4, %v1402_v50, %v1403_v49  ;;  %v1408_v29 = vunpack.i.h.bf16 %v1406_v51 }
 0x134   : > { %v1464_v56 = vpack.i.bf16 %v332_v54, %v1397_v37 }
 0x135   : > { %v333_v57 = vsel %vm329_vm4, %v1403_v49, %v1407_v53  ;;  %v331_v36 = vsel %vm329_vm4, %v1408_v29, %v1402_v50 }
 0x136   : > { %v1469_v59 = vpack.i.bf16 %v1407_v53, %v333_v57  ;;  %1465 = vrot.lane.b32.xlu1 %v1464_v56, %s1888_s20 }
 0x138   : > { %v1416_v62 = vpop.permute.xlu0 %1415  ;;  %1470 = vrot.lane.b32.xlu2 %v1469_v59, %s1888_s20  ;;  %1475 = vrot.lane.b32.xlu0 %v1474_v60, %s1888_s20  ;;  %v335_v32 = vpop.permute.xlu2 %334 }
 0x139   : > { %v1417_v2 = vunpack.i.l.bf16 %v1416_v62  ;;  %v345_v35 = vsel %vm344_vm3, %v335_v32, %v1398_v25  ;;  %v1418_v39 = vunpack.i.h.bf16 %v1416_v62 }
 0x13a   : > { %v1421_v5 = vpop.permute.xlu1 %1420 }
 0x13b   : > { %v318_v7 = vsel %vm314_vm5, %v1413_v46, %v1417_v2  ;;  %v1423_v8 = vunpack.i.h.bf16 %v1421_v5  ;;  %v1422_v12 = vunpack.i.l.bf16 %v1421_v5  ;;  %v316_v42 = vsel %vm314_vm5, %v1418_v39, %v1412_v47 }
 0x13c   : > { %v1479_v16 = vpack.i.bf16 %v1417_v2, %v318_v7 }
 0x13d   : > { %v302_v17 = vsel %vm299_vm6, %v1422_v12, %v1423_v8  ;;  %v303_v20 = vsel %vm299_vm6, %v1423_v8, %v1427_v6  ;;  %v301_v33 = vsel %vm299_vm6, %v1428_v28, %v1422_v12 }
 0x13e   : > { %1480 = vrot.lane.b32.xlu1 %v1479_v16, %s1888_s20  ;;  %v1484_v21 = vpack.i.bf16 %v302_v17, %v361_v18  ;;  %v1489_v22 = vpack.i.bf16 %v1427_v6, %v303_v20  ;;  %v1509_v38 = vpack.i.bf16 %v345_v35, %v301_v33 }
 0x140   : > { %v2158_v26 = vpop.permute.xlu0 %365  ;;  %1485 = vrot.lane.b32.xlu2 %v1484_v21, %s1888_s20  ;;  %1490 = vrot.lane.b32.xlu0 %v1489_v22, %s1888_s20  ;;  %v290_v49 = vpop.permute.xlu2 %289 }
 0x141   : > { %v2165_v23 = vsel %vm375_vm2, %v2158_v26, %v1378_v52  ;;  %v300_v47 = vsel %vm299_vm6, %v290_v49, %v1428_v28  ;;  %v1544_v52 = vpack.i.bf16 %v2085_v19, %v2064_v14 }
 0x142   : > { %v350_v34 = vpop.permute.xlu1 %349  ;;  %v1499_v37 = vpack.i.bf16 %v2165_v23, %v331_v36 }
 0x143   : > { %v360_v41 = vsel %vm359_vm1, %v350_v34, %v1388_v63 }
 0x144   : > { %v1504_v44 = vpack.i.bf16 %v360_v41, %v316_v42 }
 0x146   : > { %1495 = vrot.lane.b32.xlu1 %v1494_v27, %s1888_s20 }
 0x148   : > { %v320_v40 = vpop.permute.xlu0 %319  ;;  %1510 = vrot.lane.b32.xlu2 %v1509_v38, %s1888_s20  ;;  %1500 = vrot.lane.b32.xlu0 %v1499_v37, %s1888_s20 }
 0x149   : > { %v330_v43 = vsel %vm329_vm4, %v320_v40, %v1408_v29 }
 0x14a   : > { %v1519_v45 = vpack.i.bf16 %v330_v43, %v2064_v14  ;;  %v305_v46 = vpop.permute.xlu1 %304 }
 0x14b   : > { %v315_v50 = vsel %vm314_vm5, %v305_v46, %v1418_v39 }
 0x14c   : > { %v1529_v51 = vpack.i.bf16 %v300_v47, %v315_v50 }
 0x14e   : > { %1505 = vrot.lane.b32.xlu1 %v1504_v44, %s1888_s20 }
 0x150   : > { %1515 = vrot.lane.b32.xlu2 %v1514_v48, %s1886_s12  ;;  %1520 = vrot.lane.b32.xlu0 %v1519_v45, %s1888_s20  ;;  %v2212_v56 = vpop.permute.xlu0 %1435 }
 0x152   : > { %v2210_v55 = vpop.permute.xlu1 %1440 }
 0x156   : > { %1530 = vrot.lane.b32.xlu1 %v1529_v51, %s1888_s20 }
 0x158   : > { %1540 = vrot.lane.b32.xlu2 %v2053_v10, %s1889_s27  ;;  %1525 = vrot.lane.b32.xlu0 %v1514_v48, %s1887_s14 }
 0x15e   : > { %1535 = vrot.lane.b32.xlu1 %v2053_v10, %s1890_s28  ;;  %v2206_v10 = vpop.permute.xlu2 %1430 }
 0x15f   : > { %v1433_v50 = vunpack.i.h.bf16 %v2206_v10  ;;  %v1432_v47 = vunpack.i.l.bf16 %v2206_v10  ;;  %v1442_v10 = vunpack.i.l.bf16 %v2210_v55 }
 0x160   : > { %664 = vrot.lane.b32.xlu2 %v2085_v19, %s1886_s12  ;;  %623 = vrot.lane.b32.xlu0 %v2060_v13, %s1890_s28 }
 0x166   : > { %604 = vrot.lane.b32.xlu1 %v2060_v13, %s1889_s27  ;;  %v2208_v53 = vpop.permute.xlu2 %381 }
 0x168   : > { %1545 = vrot.lane.b32.xlu2 %v1544_v52, %s1890_s28  ;;  %645 = vrot.lane.b32.xlu0 %v2085_v19, %s1887_s14 }
 0x16e   : > { %638 = vrot.lane.b32.xlu1 %v2085_v19, %s1879_s26 }
 0x170   : > { %1550 = vrot.lane.b32.xlu0 %v1544_v52, %s1889_s27 }
 0x188   : > { %v1456_v54 = vpop.permute.xlu2 %1455 }
 0x189   : > { %v1458_v60 = vunpack.i.h.bf16 %v1456_v54  ;;  %v1457_v61 = vunpack.i.l.bf16 %v1456_v54  ;;  %v1438_v54 = vunpack.i.h.bf16 %v2212_v56 }
 0x18b   : > { %v475_v16 = vsel %vm451_vm7, %v1457_v61, %v1458_v60 }
 0x190   : > { %v1451_v59 = vpop.permute.xlu1 %1450 }
 0x191   : > { %v1453_v63 = vunpack.i.h.bf16 %v1451_v59  ;;  %v1452_v2 = vunpack.i.l.bf16 %v1451_v59 }
 0x192   : > { %v1471_v57 = vpop.permute.xlu2 %1470 }
 0x193   : > { %v474_v12 = vsel %vm451_vm7, %v1453_v63, %v1457_v61  ;;  %v1473_v30 = vunpack.i.h.bf16 %v1471_v57  ;;  %v1472_v32 = vunpack.i.l.bf16 %v1471_v57  ;;  %v1437_v57 = vunpack.i.l.bf16 %v2212_v56 }
 0x194   : > { %v1443_v61 = vunpack.i.h.bf16 %v2210_v55 }
 0x195   : > { %v467_v38 = vsel %vm451_vm7, %v1472_v32, %v1473_v30 }
 0x19a   : > { %v1446_v62 = vpop.permute.xlu0 %1445  ;;  %v2214_v6 = vpop.permute.xlu2 %1485 }
 0x19b   : > { %v1448_v5 = vunpack.i.h.bf16 %v1446_v62  ;;  %v1447_v19 = vunpack.i.l.bf16 %v1446_v62  ;;  %v1487_v34 = vunpack.i.l.bf16 %v2214_v6  ;;  %v1488_v46 = vunpack.i.h.bf16 %v2214_v6 }
 0x19d   : > { %v478_v7 = vsel %vm451_vm7, %v1447_v19, %v1448_v5  ;;  %v479_v8 = vsel %vm451_vm7, %v1448_v5, %v1452_v2  ;;  %v473_v39 = vsel %vm451_vm7, %v1487_v34, %v1453_v63  ;;  %v455_v63 = vsel %vm451_vm7, %v1432_v47, %v1433_v50 }
 0x19e   : > { %561 = vmatpush.msra.mxu2 %v478_v7  ;;  %581 = vmatpush.msra.mxu3 %v479_v8 }
 0x1a0   : > { %562 = vmatpush.msra.mxu2 %v474_v12  ;;  %582 = vmatpush.msra.mxu3 %v475_v16  ;;  %v659_v12 = vsel %vm655_vm9, %v1442_v10, %v1443_v61  ;;  %v2270_v16 = vld [vmem:[#allocation5] sm:$0xff] }
 0x1a2   : > { %v2220_v17 = vpop.permute.xlu0 %1460  ;;  %v2227_v22 = vpop.permute.xlu2 %1510 }
 0x1a3   : > { %v1463_v18 = vunpack.i.h.bf16 %v2220_v17  ;;  %v1462_v20 = vunpack.i.l.bf16 %v2220_v17 }
 0x1a5   : > { %v470_v21 = vsel %vm451_vm7, %v1462_v20, %v1463_v18 }
 0x1a6   : > { %563 = vmatpush.msra.mxu2 %v470_v21 }
 0x1a8   : > { %v2229_v25 = vpop.permute.xlu1 %1465 }
 0x1a9   : > { %v1468_v28 = vunpack.i.h.bf16 %v2229_v25  ;;  %v1467_v29 = vunpack.i.l.bf16 %v2229_v25 }
 0x1aa   : > { %v2233_v33 = vpop.permute.xlu0 %1475  ;;  %v2246_v40 = vpop.permute.xlu2 %1515 }
 0x1ab   : > { %v1477_v27 = vunpack.i.l.bf16 %v2233_v33  ;;  %v466_v35 = vsel %vm451_vm7, %v1468_v28, %v1472_v32  ;;  %v471_v36 = vsel %vm451_vm7, %v1463_v18, %v1467_v29  ;;  %v1478_v44 = vunpack.i.h.bf16 %v2233_v33 }
 0x1ac   : > { %564 = vmatpush.msra.mxu2 %v466_v35  ;;  %583 = vmatpush.msra.mxu3 %v471_v36  ;;  %v1517_v56 = vunpack.i.l.bf16 %v2246_v40 }
 0x1ad   : > { %v477_v37 = vsel %vm451_vm7, %v1477_v27, %v1447_v19  ;;  %v678_v19 = vsel %vm674_vm8, %v1437_v57, %v1438_v54 }
 0x1ae   : > { %541 = vmatpush.msra.mxu1 %v477_v37  ;;  %584 = vmatpush.msra.mxu3 %v467_v38  ;;  %v677_v32 = vsel %vm674_vm8, %v1517_v56, %v1437_v57  ;;  %v1512_v37 = vunpack.i.l.bf16 %v2227_v22 }
 0x1b0   : > { %v1481_v41 = vpop.permute.xlu1 %1480  ;;  %542 = vmatpush.msra.mxu1 %v473_v39 }
 0x1b1   : > { %v1483_v42 = vunpack.i.h.bf16 %v1481_v41  ;;  %v1482_v43 = vunpack.i.l.bf16 %v1481_v41 }
 0x1b2   : > { %v1491_v45 = vpop.permute.xlu0 %1490  ;;  %v2265_v7 = vpop.permute.xlu2 %1540 }
 0x1b3   : > { %v1493_v48 = vunpack.i.h.bf16 %v1491_v45  ;;  %v1492_v49 = vunpack.i.l.bf16 %v1491_v45  ;;  %v462_v51 = vsel %vm451_vm7, %v1478_v44, %v1482_v43  ;;  %v463_v52 = vsel %vm451_vm7, %v1482_v43, %v1483_v42 }
 0x1b4   : > { %565 = vmatpush.msra.mxu2 %v462_v51  ;;  %585 = vmatpush.msra.mxu3 %v463_v52  ;;  %v1518_v42 = vunpack.i.h.bf16 %v2246_v40  ;;  %v457_v45 = vsel %vm451_vm7, %v1512_v37, %v1488_v46  ;;  %v1542_v61 = vunpack.i.l.bf16 %v2265_v7 }
 0x1b5   : > { %v458_v59 = vsel %vm451_vm7, %v1488_v46, %v1492_v49  ;;  %v459_v60 = vsel %vm451_vm7, %v1492_v49, %v1493_v48 }
 0x1b6   : > { %566 = vmatpush.msra.mxu2 %v458_v59  ;;  %586 = vmatpush.msra.mxu3 %v459_v60  ;;  %v676_v40 = vsel %vm674_vm8, %v1518_v42, %v1517_v56  ;;  %v1543_v60 = vunpack.i.h.bf16 %v2265_v7 }
 0x1b8   : > { %v1496_v62 = vpop.permute.xlu1 %1495  ;;  %587 = vmatpush.msra.mxu3 %v455_v63 }
 0x1b9   : > { %v1498_v2 = vunpack.i.h.bf16 %v1496_v62  ;;  %v1497_v5 = vunpack.i.l.bf16 %v1496_v62  ;;  %1250 = vmatmul.msk.f32.vlgmr.msra.gmra.mxu3 %vm508_vm10, %v2270_v16 }
 0x1ba   : > { %756 = vmatpush.msrb.mxu3 %v678_v19  ;;  %v1501_v8 = vpop.permute.xlu0 %1500  ;;  %v665_v25 = vpop.permute.xlu2 %664  ;;  %v614_v19 = vsel %vm610_vm12, %v1542_v61, %v1543_v60 }
 0x1bb   : > { %v1503_v18 = vunpack.i.h.bf16 %v1501_v8  ;;  %v1502_v21 = vunpack.i.l.bf16 %v1501_v8  ;;  %v469_v29 = vsel %vm451_vm7, %v1497_v5, %v1462_v20  ;;  %v2276_v30 = vsel %vm451_vm7, %v1498_v2, %v1432_v47 }
 0x1bc   : > { %757 = vmatpush.msrb.mxu3 %v659_v12  ;;  %543 = vmatpush.msra.mxu1 %v469_v29  ;;  %v683_v12 = vld [vmem:[#allocation7] sm:$0xff] }
 0x1bd   : > { %567 = vmatpush.msra.mxu2 %v2276_v30  ;;  %v476_v33 = vsel %vm451_vm7, %v1503_v18, %v1477_v27  ;;  %v465_v17 = vsel %vm451_vm7, %v1502_v21, %v1468_v28  ;;  %v1513_v27 = vunpack.i.h.bf16 %v2227_v22 }
 0x1be   : > { %758 = vmatpush.msrb.mxu3 %v2121_v31  ;;  %521 = vmatpush.msra.mxu0 %v476_v33 }
 0x1bf   : > { %736 = vmatpush.msrb.mxu2 %v677_v32  ;;  %544 = vmatpush.msra.mxu1 %v465_v17  ;;  %v468_v43 = vsel %vm451_vm7, %v1513_v27, %v1497_v5 }
 0x1c0   : > { %759 = vmatpush.msrb.mxu3 %v455_v63  ;;  %v1506_v20 = vpop.permute.xlu1 %1505  ;;  %1249 = vmatmul.msk.f32.vlgmr.msra.gmra.mxu2 %vm508_vm10, %v2270_v16 }
 0x1c1   : > { %v1508_v35 = vunpack.i.h.bf16 %v1506_v20  ;;  %v1507_v36 = vunpack.i.l.bf16 %v1506_v20 }
 0x1c2   : > { %v1521_v38 = vpop.permute.xlu0 %1520  ;;  %v1546_v57 = vpop.permute.xlu2 %1545 }
 0x1c3   : > { %v1523_v39 = vunpack.i.h.bf16 %v1521_v38  ;;  %v1522_v28 = vunpack.i.l.bf16 %v1521_v38  ;;  %v472_v31 = vsel %vm451_vm7, %v1508_v35, %v1487_v34  ;;  %v461_v41 = vsel %vm451_vm7, %v1507_v36, %v1478_v44 }
 0x1c4   : > { %522 = vmatpush.msra.mxu0 %v472_v31  ;;  %545 = vmatpush.msra.mxu1 %v461_v41  ;;  %v1547_v63 = vunpack.i.l.bf16 %v1546_v57  ;;  %v1548_v29 = vunpack.i.h.bf16 %v1546_v57  ;;  %v595_v38 = vperm.slane %v2035_v1, 4 }
 0x1c5   : > { %v464_v48 = vsel %vm451_vm7, %v1523_v39, %v1502_v21  ;;  %v453_v49 = vsel %vm451_vm7, %v1522_v28, %v1498_v2  ;;  %v452_v59 = vsel %vm451_vm7, %v2208_v53, %v1522_v28  ;;  %v593_v28 = vperm.slane %v2044_v4, 4 }
 0x1c6   : > { %523 = vmatpush.msra.mxu0 %v468_v43  ;;  %546 = vmatpush.msra.mxu1 %v457_v45  ;;  %v630_v20 = vsel %vm629_vm11, %v1548_v29, %v1547_v63  ;;  %v592_v43 = vperm.slane %v2039_v3, 4 }
 0x1c8   : > { %v1531_v22 = vpop.permute.xlu1 %1530  ;;  %524 = vmatpush.msra.mxu0 %v464_v48  ;;  %547 = vmatpush.msra.mxu1 %v453_v49  ;;  %v767_v48 = vperm.slane %v2039_v3, 5 }
 0x1c9   : > { %v1533_v34 = vunpack.i.h.bf16 %v1531_v22  ;;  %v1532_v50 = vunpack.i.l.bf16 %v1531_v22  ;;  %1248 = vmatmul.msk.f32.vlgmr.msra.gmra.mxu1 %vm508_vm10, %v2270_v16 }
 0x1ca   : > { %v1526_v44 = vpop.permute.xlu0 %1525  ;;  %716 = vmatpush.msrb.mxu1 %v676_v40  ;;  %v768_v40 = vperm.slane %v2044_v4, 5 }
 0x1cb   : > { %v1528_v6 = vunpack.i.h.bf16 %v1526_v44  ;;  %v1527_v46 = vunpack.i.l.bf16 %v1526_v44  ;;  %v460_v47 = vsel %vm451_vm7, %v1532_v50, %v1507_v36  ;;  %v456_v51 = vsel %vm451_vm7, %v1533_v34, %v1512_v37 }
 0x1cc   : > { %525 = vmatpush.msra.mxu0 %v460_v47 }
 0x1cd   : > { %v657_v52 = vsel %vm655_vm9, %v1528_v6, %v1527_v46  ;;  %v658_v54 = vsel %vm655_vm9, %v1527_v46, %v1442_v10  ;;  %v675_v10 = vsel %vm674_vm8, %v665_v25, %v1518_v42  ;;  %v769_v46 = vperm.slane %v2033_v0, 5 }
 0x1ce   : > { %526 = vmatpush.msra.mxu0 %v456_v51  ;;  %717 = vmatpush.msrb.mxu1 %v657_v52 }
 0x1cf   : > { %737 = vmatpush.msrb.mxu2 %v658_v54 }
 0x1d0   : > { %v1536_v62 = vpop.permute.xlu1 %1535  ;;  %527 = vmatpush.msra.mxu0 %v452_v59  ;;  %718 = vmatpush.msrb.mxu1 %v2165_v23 }
 0x1d1   : > { %v1538_v56 = vunpack.i.h.bf16 %v1536_v62  ;;  %v1537_v55 = vunpack.i.l.bf16 %v1536_v62  ;;  %738 = vmatpush.msrb.mxu2 %v2145_v58  ;;  %1247 = vmatmul.msk.f32.vlgmr.msra.gmra.mxu0 %vm508_vm10, %v2270_v16  ;;  %v1017_v58 = vrot.slane %v2035_v1, 4  ;;  %v1016_v16 = vrot.slane %v2033_v0, 4 }
 0x1d2   : > { %696 = vmatpush.msrb.mxu0 %v675_v10  ;;  %v624_v53 = vpop.permute.xlu0 %623  ;;  %719 = vmatpush.msrb.mxu1 %v453_v49 }
 0x1d3   : > { %739 = vmatpush.msrb.mxu2 %v2276_v30  ;;  %v631_v2 = vsel %vm629_vm11, %v1547_v63, %v624_v53  ;;  %v632_v23 = vsel %vm629_vm11, %v624_v53, %v1537_v55  ;;  %v633_v5 = vsel %vm629_vm11, %v1537_v55, %v1538_v56 }
 0x1d4   : > { %720 = vmatpush.msrb.mxu1 %v631_v2  ;;  %760 = vmatpush.msrb.mxu3 %v633_v5 }
 0x1d5   : > { %740 = vmatpush.msrb.mxu2 %v632_v23 }
 0x1d6   : > { %761 = vmatpush.msrb.mxu3 %v614_v19 }
 0x1d8   : > { %v605_v7 = vpop.permute.xlu1 %604  ;;  %762 = vmatpush.msrb.mxu3 %v2050_v9 }
 0x1d9   : > { %v613_v8 = vsel %vm610_vm12, %v605_v7, %v1542_v61  ;;  %1256 = vmatmul.msk.f32.vlgmr.msrb.gmra.mxu3 %vm508_vm10, %v683_v12 }
 0x1da   : > { %1265 = vmatpush.msk.msra.mxu3 %vm1023_vm13, %v1017_v58  ;;  %v646_v18 = vpop.permute.xlu0 %645  ;;  %741 = vmatpush.msrb.mxu2 %v613_v8 }
 0x1db   : > { %v656_v21 = vsel %vm655_vm9, %v646_v18, %v1528_v6 }
 0x1dc   : > { %1094 = vmatpush.msra.mxu3 %v2113_v24  ;;  %697 = vmatpush.msrb.mxu0 %v656_v21 }
 0x1dd   : > { %742 = vmatpush.msrb.mxu2 %v2060_v13  ;;  %v1015_v13 = vrot.slane %v2044_v4, 4 }
 0x1de   : > { %1255 = vmatmul.msk.f32.vlgmr.msrb.gmra.mxu2 %vm508_vm10, %v683_v12 }
 0x1df   : > { %1263 = vmatpush.msk.msra.mxu2 %vm1023_vm13, %v1016_v16 }
 0x1e0   : > { %v639_v9 = vpop.permute.xlu1 %638 }
 0x1e1   : > { %v640_v30 = vsel %vm375_vm2, %v639_v9, %v2158_v26  ;;  %v1014_v26 = vrot.slane %v2039_v3, 4  ;;  %v770_v3 = vperm.slane %v2035_v1, 5 }
 0x1e2   : > { %v1551_v32 = vpop.permute.xlu0 %1550  ;;  %698 = vmatpush.msrb.mxu0 %v640_v30 }
 0x1e3   : > { %v1553_v33 = vunpack.i.h.bf16 %v1551_v32  ;;  %v1552_v17 = vunpack.i.l.bf16 %v1551_v32 }
 0x1e4   : > { %699 = vmatpush.msrb.mxu0 %v452_v59 }
 0x1e5   : > { %v612_v35 = vsel %vm610_vm12, %v1552_v17, %v605_v7  ;;  %v611_v36 = vsel %vm610_vm12, %v1553_v33, %v1552_v17 }
 0x1e6   : > { %700 = vmatpush.msrb.mxu0 %v630_v20  ;;  %721 = vmatpush.msrb.mxu1 %v612_v35 }
 0x1e8   : > { %701 = vmatpush.msrb.mxu0 %v611_v36  ;;  %722 = vmatpush.msrb.mxu1 %v2064_v14  ;;  %v594_v14 = vperm.slane %v2033_v0, 4 }
 0x1e9   : > { %1254 = vmatmul.msk.f32.vlgmr.msrb.gmra.mxu1 %vm508_vm10, %v683_v12 }
 0x1ea   : > { %1252 = vmatpush.msk.msrb.mxu0 %vm2343_vm14, %v2057_v11  ;;  %1261 = vmatpush.msk.msra.mxu1 %vm1023_vm13, %v1015_v13 }
 0x1eb   : > { %1253 = vmatmul.msk.f32.vlgmr.msrb.gmra.mxu0 %vm508_vm10, %v683_v12 }
 0x1ec   : > { %1257 = vmatpush.msk.msra.mxu0 %vm1023_vm13, %v1014_v26 }
 0x23c   : > { %v589_v27 = vpop.f32.mrf.mxu3 }
 0x23d   : > { %v599_v25 = vmul.f32 %v595_v38, %v589_v27 }
 0x23f   : > { %785 = vrot.lane.b32.xlu2 %v599_v25, %s1878_s21 }
 0x243   : > { %v569_v39 = vpop.f32.mrf.mxu2 }
 0x244   : > { %v598_v31 = vmul.f32 %v594_v14, %v569_v39 }
 0x246   : > { %v549_v41 = vpop.f32.mrf.mxu1 }
 0x247   : > { %v597_v11 = vmul.f32 %v593_v28, %v549_v41 }
 0x249   : > { %v1554_v42 = vpack.i.bf16 %v598_v31, %v597_v11 }
 0x24b   : > { %1555 = vrot.lane.b32.xlu1 %v1554_v42, %s1878_s21 }
 0x24e   : > { %v529_v45 = vpop.f32.mrf.mxu0 }
 0x24f   : > { %v596_v22 = vmul.f32 %v592_v43, %v529_v45 }
 0x251   : > { %779 = vrot.lane.b32.xlu0 %v596_v22, %s1878_s21  ;;  %s1128_s21 = scalar_lea.hbm %s2601_s4, %s1273_s29 }
 0x261   : > { %v744_v47 = vpop.f32.mrf.mxu2 }
 0x262   : > { %v2388_v51 = vmul.f32 %v769_v46, %v744_v47 }
 0x266   : > { %v724_v44 = vpop.f32.mrf.mxu1 }
 0x267   : > { %v2372_v6 = vmul.f32 %v768_v40, %v724_v44 }
 0x268   : > { %v704_v49 = vpop.f32.mrf.mxu0 }
 0x269   : > { %v2364_v34 = vmul.f32 %v767_v48, %v704_v49 }
 0x26b   : > { %v1569_v50 = vpack.i.bf16 %v2364_v34, %v1880_v15  ;;  %v764_v15 = vpop.f32.mrf.mxu3 }
 0x26c   : > { %v2384_v4 = vmul.f32 %v770_v3, %v764_v15 }
 0x26d   : > { %1570 = vrot.lane.b32.xlu1 %v1569_v50, %s1883_s9  ;;  %1560 = vrot.lane.b32.xlu0 %v1569_v50, %s1881_s6 }
 0x26e   : > { %1565 = vrot.lane.b32.xlu2 %v1569_v50, %s1882_s8  ;;  %v1584_v52 = vpack.i.bf16 %v2372_v6, %v2384_v4  ;;  %v1589_v1 = vpack.i.bf16 %v2384_v4, %v2388_v51 }
 0x275   : > { %1575 = vrot.lane.b32.xlu1 %v1569_v50, %s1884_s10  ;;  %949 = vrot.lane.b32.xlu0 %v2372_v6, %s1883_s9 }
 0x276   : > { %985 = vrot.lane.b32.xlu2 %v2372_v6, %s1881_s6 }
 0x27d   : > { %1580 = vrot.lane.b32.xlu1 %v1569_v50, %s1885_s11  ;;  %931 = vrot.lane.b32.xlu0 %v2372_v6, %s1884_s10 }
 0x27e   : > { %967 = vrot.lane.b32.xlu2 %v2372_v6, %s1882_s8 }
 0x285   : > { %1585 = vrot.lane.b32.xlu1 %v1584_v52, %s1879_s26  ;;  %913 = vrot.lane.b32.xlu0 %v2372_v6, %s1885_s11 }
 0x286   : > { %1590 = vrot.lane.b32.xlu2 %v1589_v1, %s1881_s6 }
 0x28d   : > { %1595 = vrot.lane.b32.xlu1 %v1589_v1, %s1882_s8  ;;  %1600 = vrot.lane.b32.xlu0 %v1589_v1, %s1883_s9  ;;  %s1132_s8 = sshll.u32 %s1128_s21, 4  ;;  %s1133_s8 = int_to_ptr.hbm [resolvable:$true] %s1132_s8 }
 0x28e   : > { %s1813_s9 = sshra.s32 %s1133_s8, 4  ;;  %s1814_s9 = int_to_ptr.hbm [resolvable:$true] %s1813_s9 }
 0x28f   : > { %p1820_p9 = scmp.lt.s32.totalorder %s1814_s9, %s2601_s4 }
 0x295   : > { %1605 = vrot.lane.b32.xlu0 %v1589_v1, %s1884_s10  ;;  %s1815_s10 = scalar_lea.hbm %s1814_s9, 32 }
 0x296   : > { %p1816_p1 = scmp.ne.s32.totalorder %s1814_s9, %s1815_s10 }
 0x298   : > { %p1817_p4 = pnand %p1816_p1, %p1988_p3 }
 0x299   : > { %v786_v59 = vpop.permute.xlu2 %785 }
 0x29a   : > { %v796_v61 = vsel %vm276_vm0, %v786_v59, 0.0  ;;  %p1818_p8 = pneg %p1817_p4 }
 0x29d   : > { %1610 = vrot.lane.b32.xlu0 %v1589_v1, %s1885_s11 }
 0x2bd   : > { %v1556_v0 = vpop.permute.xlu1 %1555 }
 0x2be   : > { %v1558_v54 = vunpack.i.h.bf16 %v1556_v0  ;;  %v1557_v57 = vunpack.i.l.bf16 %v1556_v0 }
 0x2c0   : > { %v2403_v60 = vsel %vm276_vm0, %v1557_v57, %v1558_v54  ;;  %v2425_v2 = vsel %vm276_vm0, %v1558_v54, %v786_v59 }
 0x2c1   : > { %v1614_v62 = vpack.i.bf16 %v2403_v60, %v2388_v51  ;;  %v1619_v5 = vpack.i.bf16 %v2425_v2, %v2403_v60  ;;  %v1639_v9 = vpack.i.bf16 %v796_v61, %v2425_v2 }
 0x2c3   : > { %v2408_v63 = vpop.permute.xlu0 %779  ;;  %1615 = vrot.lane.b32.xlu2 %v1614_v62, %s1879_s26 }
 0x2c4   : > { %v2413_v56 = vsel %vm276_vm0, %v2408_v63, %v1557_v57  ;;  %v795_v55 = vsel %vm276_vm0, 0.0, %v2408_v63 }
 0x2c5   : > { %891 = vrot.lane.b32.xlu1 %v2413_v56, %s1886_s12  ;;  %v1654_v10 = vpack.i.bf16 %v795_v55, %v796_v61  ;;  %v1644_v17 = vpack.i.bf16 %v2413_v56, %v795_v55 }
 0x2c7   : > { %1655 = vrot.lane.b32.xlu0 %v1654_v10, %s1888_s20 }
 0x2c8   : > { %v1566_v53 = vpop.permute.xlu2 %1565 }
 0x2c9   : > { %v1568_v19 = vunpack.i.h.bf16 %v1566_v53  ;;  %v1567_v28 = vunpack.i.l.bf16 %v1566_v53 }
 0x2cb   : > { %1625 = vrot.lane.b32.xlu2 %v1654_v10, %s1886_s12 }
 0x2cd   : > { %873 = vrot.lane.b32.xlu1 %v2413_v56, %s1887_s14 }
 0x2cf   : > { %1665 = vrot.lane.b32.xlu0 %v1654_v10, %s1890_s28 }
 0x2d0   : > { %v2427_v23 = vpop.permute.xlu2 %985 }
 0x2d3   : > { %1635 = vrot.lane.b32.xlu2 %v1654_v10, %s1887_s14 }
 0x2d5   : > { %1620 = vrot.lane.b32.xlu1 %v1619_v5, %s1886_s12  ;;  %s1819_s12 = scalar_lea.hbm %s2601_s4, 64 }
 0x2d6   : > { %p1821_p10 = scmp.lt.s32.totalorder %s1819_s12, %s1815_s10 }
 0x2d7   : > { %807 = vrot.lane.b32.xlu0 %v796_v61, %s1889_s27 }
 0x2d8   : > { %v2434_v58 = vpop.permute.xlu2 %967  ;;  %p1822_p2 = por %p1821_p10, %p1820_p9 }
 0x2d9   : > { %v2440_v7 = vsel %vm344_vm3, %v1568_v19, %v2434_v58 }
 0x2da   : > { %p1823_p11 = pnand %p1822_p2, %p1818_p8 }
 0x2db   : > { %1650 = vrot.lane.b32.xlu2 %v1619_v5, %s1888_s20 }
 0x2dd   : > { %1630 = vrot.lane.b32.xlu1 %v1619_v5, %s1887_s14 }
 0x2df   : > { %v2442_v8 = vpop.permute.xlu1 %1570  ;;  %819 = vrot.lane.b32.xlu0 %v2413_v56, %s1890_s28  ;;  %v1561_v12 = vpop.permute.xlu0 %1560 }
 0x2e0   : > { %v1562_v16 = vunpack.i.l.bf16 %v1561_v12  ;;  %v2446_v18 = vpop.permute.xlu2 %1590  ;;  %v1563_v30 = vunpack.i.h.bf16 %v1561_v12  ;;  %v1572_v39 = vunpack.i.l.bf16 %v2442_v8  ;;  %v1573_v53 = vunpack.i.h.bf16 %v2442_v8 }
 0x2e1   : > { %v1593_v21 = vunpack.i.h.bf16 %v2446_v18  ;;  %v1592_v27 = vunpack.i.l.bf16 %v2446_v18 }
 0x2e2   : > { %v993_v20 = vsel %vm359_vm1, %v1563_v30, %v2427_v23 }
 0x2e3   : > { %v996_v29 = vsel %vm359_vm1, %v1593_v21, %v1562_v16  ;;  %1660 = vrot.lane.b32.xlu2 %v1619_v5, %s1890_s28  ;;  %v995_v14 = vsel %vm359_vm1, %v1592_v27, %v1593_v21 }
 0x2e4   : > { %1095 = vmatpush.msra.mxu3 %v996_v29 }
 0x2e5   : > { %1640 = vrot.lane.b32.xlu1 %v1639_v9, %s1879_s26 }
 0x2e7   : > { %v2453_v32 = vpop.permute.xlu1 %1575  ;;  %v2455_v33 = vpop.permute.xlu0 %949 }
 0x2e8   : > { %v1577_v50 = vunpack.i.l.bf16 %v2453_v32  ;;  %v957_v12 = vsel %vm329_vm4, %v1573_v53, %v2455_v33 }
 0x2eb   : > { %1670 = vrot.lane.b32.xlu2 %v1619_v5, %s1889_s27  ;;  %v994_v5 = vsel %vm359_vm1, %v2427_v23, %v1592_v27 }
 0x2ed   : > { %1645 = vrot.lane.b32.xlu1 %v1644_v17, %s1879_s26  ;;  %s259_s26 = scalar_lea.vmem [#allocation10], %s1242_s30 }
 0x2ee   : > { %s1130_s6 = sshll.u32 %s259_s26, 4  ;;  %s1131_s6 = int_to_ptr.vmem [resolvable:$true] %s1130_s6 }
 0x2ef   : > { %v2462_v35 = vpop.permute.xlu1 %1580  ;;  %v2464_v13 = vpop.permute.xlu0 %931 }
 0x2f0   : > { %v1582_v47 = vunpack.i.l.bf16 %v2462_v35  ;;  %v1583_v19 = vunpack.i.h.bf16 %v2462_v35 }
 0x2f3   : > { %837 = vrot.lane.b32.xlu2 %v2413_v56, %s1888_s20 }
 0x2f5   : > { %1675 = vrot.lane.b32.xlu1 %v1644_v17, %s1889_s27 }
 0x2f7   : > { %v1586_v36 = vpop.permute.xlu1 %1585  ;;  %v2469_v26 = vpop.permute.xlu0 %913 }
 0x2f8   : > { %v1587_v38 = vunpack.i.l.bf16 %v1586_v36  ;;  %v1588_v59 = vunpack.i.h.bf16 %v1586_v36 }
 0x2fa   : > { %v1009_v25 = vsel %vm375_vm2, %v1587_v38, %v2113_v24 }
 0x2fb   : > { %1074 = vmatpush.msra.mxu2 %v1009_v25 }
 0x2fd   : > { %1075 = vmatpush.msra.mxu2 %v995_v14 }
 0x2ff   : > { %v1596_v31 = vpop.permute.xlu1 %1595  ;;  %v1601_v41 = vpop.permute.xlu0 %1600 }
 0x300   : > { %v1598_v11 = vunpack.i.h.bf16 %v1596_v31  ;;  %v1597_v42 = vunpack.i.l.bf16 %v1596_v31  ;;  %v1603_v43 = vunpack.i.h.bf16 %v1601_v41  ;;  %v1602_v45 = vunpack.i.l.bf16 %v1601_v41 }
 0x302   : > { %v978_v22 = vsel %vm344_vm3, %v1598_v11, %v1567_v28  ;;  %v977_v48 = vsel %vm344_vm3, %v1597_v42, %v1598_v11  ;;  %v959_v49 = vsel %vm329_vm4, %v1602_v45, %v1603_v43  ;;  %v960_v24 = vsel %vm329_vm4, %v1603_v43, %v1572_v39 }
 0x303   : > { %1096 = vmatpush.msra.mxu3 %v978_v22  ;;  %1076 = vmatpush.msra.mxu2 %v977_v48  ;;  %v958_v8 = vsel %vm329_vm4, %v2455_v33, %v1602_v45 }
 0x305   : > { %1077 = vmatpush.msra.mxu2 %v959_v49  ;;  %1097 = vmatpush.msra.mxu3 %v960_v24 }
 0x307   : > { %v1606_v40 = vpop.permute.xlu0 %1605 }
 0x308   : > { %v1608_v44 = vunpack.i.h.bf16 %v1606_v40  ;;  %v1607_v3 = vunpack.i.l.bf16 %v1606_v40 }
 0x30a   : > { %v941_v15 = vsel %vm314_vm5, %v1607_v3, %v1608_v44  ;;  %v942_v46 = vsel %vm314_vm5, %v1608_v44, %v1577_v50  ;;  %v940_v16 = vsel %vm314_vm5, %v2464_v13, %v1607_v3 }
 0x30b   : > { %1078 = vmatpush.msra.mxu2 %v941_v15  ;;  %1098 = vmatpush.msra.mxu3 %v942_v46 }
 0x30f   : > { %v1611_v52 = vpop.permute.xlu0 %1610 }
 0x310   : > { %v1613_v1 = vunpack.i.h.bf16 %v1611_v52  ;;  %v1612_v0 = vunpack.i.l.bf16 %v1611_v52 }
 0x312   : > { %v923_v54 = vsel %vm299_vm6, %v1612_v0, %v1613_v1  ;;  %v924_v57 = vsel %vm299_vm6, %v1613_v1, %v1582_v47 }
 0x313   : > { %1079 = vmatpush.msra.mxu2 %v923_v54  ;;  %1099 = vmatpush.msra.mxu3 %v924_v57 }
 0x315   : > { %1080 = vmatpush.msra.mxu2 %v2388_v51  ;;  %1100 = vmatpush.msra.mxu3 %v2384_v4  ;;  %v1578_v4 = vunpack.i.h.bf16 %v2453_v32  ;;  %v976_v51 = vsel %vm344_vm3, %v2434_v58, %v1597_v42  ;;  %v921_v58 = vsel %vm299_vm6, %v1583_v19, %v2469_v26 }
 0x317   : > { %v939_v23 = vsel %vm314_vm5, %v1578_v4, %v2464_v13 }
 0x31d   : > { %v2488_v61 = vpop.permute.xlu2 %1615 }
 0x31e   : > { %v1617_v62 = vunpack.i.l.bf16 %v2488_v61  ;;  %v1618_v45 = vunpack.i.h.bf16 %v2488_v61 }
 0x320   : > { %v1007_v55 = vsel %vm375_vm2, %v1588_v59, %v1617_v62  ;;  %v1008_v10 = vsel %vm375_vm2, %v1617_v62, %v1587_v38 }
 0x321   : > { %1034 = vmatpush.msra.mxu0 %v1007_v55  ;;  %1054 = vmatpush.msra.mxu1 %v1008_v10 }
 0x323   : > { %1035 = vmatpush.msra.mxu0 %v993_v20  ;;  %1055 = vmatpush.msra.mxu1 %v994_v5 }
 0x325   : > { %1056 = vmatpush.msra.mxu1 %v976_v51  ;;  %1036 = vmatpush.msra.mxu0 %v2440_v7  ;;  %v922_v7 = vsel %vm299_vm6, %v2469_v26, %v1612_v0  ;;  %v1626_v18 = vpop.permute.xlu2 %1625 }
 0x326   : > { %v1628_v21 = vunpack.i.h.bf16 %v1626_v18 }
 0x327   : > { %1037 = vmatpush.msra.mxu0 %v957_v12  ;;  %1057 = vmatpush.msra.mxu1 %v958_v8 }
 0x329   : > { %1038 = vmatpush.msra.mxu0 %v939_v23  ;;  %1058 = vmatpush.msra.mxu1 %v940_v16  ;;  %v1018_v16 = vld [vmem:[#allocation8] sm:$0xff] }
 0x32b   : > { %1039 = vmatpush.msra.mxu0 %v921_v58  ;;  %1059 = vmatpush.msra.mxu1 %v922_v7 }
 0x32d   : > { %1040 = vmatpush.msra.mxu0 %v2364_v34  ;;  %1060 = vmatpush.msra.mxu1 %v2372_v6  ;;  %v1636_v30 = vpop.permute.xlu2 %1635  ;;  %v1627_v34 = vunpack.i.l.bf16 %v1626_v18 }
 0x32e   : > { %v1638_v32 = vunpack.i.h.bf16 %v1636_v30  ;;  %v1637_v28 = vunpack.i.l.bf16 %v1636_v30 }
 0x335   : > { %v2517_v20 = vpop.permute.xlu2 %1650 }
 0x336   : > { %v1653_v22 = vunpack.i.h.bf16 %v2517_v20  ;;  %v1652_v24 = vunpack.i.l.bf16 %v2517_v20 }
 0x337   : > { %v892_v9 = vpop.permute.xlu1 %891 }
 0x338   : > { %v899_v29 = vsel %vm674_vm8, %v1628_v21, %v892_v9  ;;  %v847_v57 = vsel %vm451_vm7, %v1652_v24, %v1653_v22 }
 0x339   : > { %1041 = vmatpush.msra.mxu0 %v899_v29  ;;  %v2519_v35 = vpop.permute.xlu0 %1655 }
 0x33a   : > { %v1657_v50 = vunpack.i.l.bf16 %v2519_v35  ;;  %v1658_v19 = vunpack.i.h.bf16 %v2519_v35 }
 0x33c   : > { %v848_v59 = vsel %vm451_vm7, %v1653_v22, %v1657_v50 }
 0x33d   : > { %v2524_v25 = vpop.permute.xlu2 %1660 }
 0x33e   : > { %v1663_v3 = vunpack.i.h.bf16 %v2524_v25  ;;  %v1662_v46 = vunpack.i.l.bf16 %v2524_v25 }
 0x33f   : > { %v874_v33 = vpop.permute.xlu1 %873 }
 0x340   : > { %v881_v17 = vsel %vm655_vm9, %v1638_v32, %v874_v33  ;;  %v829_v61 = vsel %vm629_vm11, %v1662_v46, %v1663_v3 }
 0x341   : > { %1042 = vmatpush.msra.mxu0 %v881_v17  ;;  %v1666_v14 = vpop.permute.xlu0 %1665 }
 0x342   : > { %v1667_v47 = vunpack.i.l.bf16 %v1666_v14  ;;  %v1668_v58 = vunpack.i.h.bf16 %v1666_v14 }
 0x344   : > { %v830_v62 = vsel %vm629_vm11, %v1663_v3, %v1667_v47 }
 0x345   : > { %v1671_v48 = vpop.permute.xlu2 %1670 }
 0x346   : > { %v1673_v0 = vunpack.i.h.bf16 %v1671_v48  ;;  %v1672_v54 = vunpack.i.l.bf16 %v1671_v48 }
 0x347   : > { %v1621_v13 = vpop.permute.xlu1 %1620 }
 0x348   : > { %v1623_v36 = vunpack.i.h.bf16 %v1621_v13  ;;  %v1622_v6 = vunpack.i.l.bf16 %v1621_v13  ;;  %v811_v5 = vsel %vm610_vm12, %v1672_v54, %v1673_v0 }
 0x349   : > { %v808_v15 = vpop.permute.xlu0 %807 }
 0x34a   : > { %v900_v26 = vsel %vm674_vm8, %v892_v9, %v1622_v6  ;;  %v901_v38 = vsel %vm674_vm8, %v1622_v6, %v1623_v36  ;;  %v902_v27 = vsel %vm674_vm8, %v1623_v36, %v1627_v34  ;;  %v812_v4 = vsel %vm610_vm12, %v1673_v0, %v808_v15 }
 0x34b   : > { %1061 = vmatpush.msra.mxu1 %v900_v26  ;;  %1081 = vmatpush.msra.mxu2 %v901_v38 }
 0x34c   : > { %1101 = vmatpush.msra.mxu3 %v902_v27 }
 0x34d   : > { %v838_v51 = vpop.permute.xlu2 %837 }
 0x34e   : > { %v845_v7 = vsel %vm451_vm7, %v1658_v19, %v838_v51  ;;  %v846_v18 = vsel %vm451_vm7, %v838_v51, %v1652_v24 }
 0x34f   : > { %v1631_v39 = vpop.permute.xlu1 %1630 }
 0x350   : > { %v1633_v31 = vunpack.i.h.bf16 %v1631_v39  ;;  %v1632_v41 = vunpack.i.l.bf16 %v1631_v39 }
 0x351   : > { %v820_v23 = vpop.permute.xlu0 %819 }
 0x352   : > { %v882_v11 = vsel %vm655_vm9, %v874_v33, %v1632_v41  ;;  %v883_v42 = vsel %vm655_vm9, %v1632_v41, %v1633_v31  ;;  %v884_v43 = vsel %vm655_vm9, %v1633_v31, %v1637_v28  ;;  %v827_v21 = vsel %vm629_vm11, %v1668_v58, %v820_v23 }
 0x353   : > { %1062 = vmatpush.msra.mxu1 %v882_v11  ;;  %1082 = vmatpush.msra.mxu2 %v883_v42  ;;  %v828_v9 = vsel %vm629_vm11, %v820_v23, %v1662_v46 }
 0x354   : > { %1102 = vmatpush.msra.mxu3 %v884_v43 }
 0x357   : > { %v1641_v49 = vpop.permute.xlu1 %1640 }
 0x358   : > { %v1643_v40 = vunpack.i.h.bf16 %v1641_v49  ;;  %v1642_v44 = vunpack.i.l.bf16 %v1641_v49 }
 0x35a   : > { %v865_v52 = vsel %vm375_vm2, %v1618_v45, %v1642_v44  ;;  %v866_v1 = vsel %vm375_vm2, %v1642_v44, %v1643_v40 }
 0x35b   : > { %1083 = vmatpush.msra.mxu2 %v865_v52  ;;  %1103 = vmatpush.msra.mxu3 %v866_v1 }
 0x35d   : > { %1084 = vmatpush.msra.mxu2 %v847_v57  ;;  %1104 = vmatpush.msra.mxu3 %v848_v59 }
 0x35f   : > { %v1646_v55 = vpop.permute.xlu1 %1645  ;;  %1085 = vmatpush.msra.mxu2 %v829_v61  ;;  %1105 = vmatpush.msra.mxu3 %v830_v62 }
 0x360   : > { %v1648_v10 = vunpack.i.h.bf16 %v1646_v55  ;;  %v1647_v53 = vunpack.i.l.bf16 %v1646_v55 }
 0x361   : > { %1086 = vmatpush.msra.mxu2 %v811_v5  ;;  %1106 = vmatpush.msra.mxu3 %v812_v4 }
 0x362   : > { %v863_v12 = vsel %vm375_vm2, %v1647_v53, %v1648_v10  ;;  %v864_v8 = vsel %vm375_vm2, %v1648_v10, %v1618_v45 }
 0x363   : > { %1043 = vmatpush.msra.mxu0 %v863_v12  ;;  %1063 = vmatpush.msra.mxu1 %v864_v8 }
 0x364   : > { %1087 = vmatpush.msra.mxu2 %v2403_v60  ;;  %1107 = vmatpush.msra.mxu3 %v2425_v2 }
 0x365   : > { %1044 = vmatpush.msra.mxu0 %v845_v7  ;;  %1064 = vmatpush.msra.mxu1 %v846_v18 }
 0x366   : > { %1264 = vmatmul.msk.f32.vlgmr.msra.gmra.mxu2 %vm1019_vm15, %v1018_v16  ;;  %1266 = vmatmul.msk.f32.vlgmr.msra.gmra.mxu3 %vm1019_vm15, %v1018_v16 }
 0x367   : > { %v1676_v29 = vpop.permute.xlu1 %1675  ;;  %1045 = vmatpush.msra.mxu0 %v827_v21  ;;  %1065 = vmatpush.msra.mxu1 %v828_v9 }
 0x368   : > { %v1678_v60 = vunpack.i.h.bf16 %v1676_v29  ;;  %v1677_v2 = vunpack.i.l.bf16 %v1676_v29 }
 0x36a   : > { %v809_v30 = vsel %vm610_vm12, %v1677_v2, %v1678_v60  ;;  %v810_v32 = vsel %vm610_vm12, %v1678_v60, %v1672_v54 }
 0x36b   : > { %1046 = vmatpush.msra.mxu0 %v809_v30  ;;  %1066 = vmatpush.msra.mxu1 %v810_v32 }
 0x36d   : > { %1259 = vmatpush.msk.msra.mxu0 %vm2343_vm14, %v2408_v63  ;;  %1067 = vmatpush.msra.mxu1 %v2413_v56 }
 0x36e   : > { %1260 = vmatmul.msk.f32.vlgmr.msra.gmra.mxu0 %vm1019_vm15, %v1018_v16  ;;  %1262 = vmatmul.msk.f32.vlgmr.msra.gmra.mxu1 %vm1019_vm15, %v1018_v16 }
 0x3e9   : > { %v1089_v33 = vpop.f32.mrf.mxu2  ;;  %v1109_v37 = vpop.f32.mrf.mxu3 }
 0x3ea   : > { %1114 = vst [vmem:[%s259_s26 + $0x10] sm:$0xff] %v1089_v33 }
 0x3eb   : > { %v1049_v63 = vpop.f32.mrf.mxu0  ;;  %v1069_v56 = vpop.f32.mrf.mxu1  ;;  %1115 = vst [vmem:[%s259_s26 + $0x18] sm:$0xff] %v1109_v37 }
 0x3ec   : > { %1112 = vst [vmem:[%s259_s26] sm:$0xff] %v1049_v63 }
 0x3ed   : > { %1113 = vst [vmem:[%s259_s26 + $0x8] sm:$0xff] %v1069_v56 }
 0x3ee   : > { %1826 = shalt.err (!%p1823_p11)
}
 0x3ef   : > { %1288 = dma.vmem_to_hbm [thread:$0]  (%p1988_p3), %s1131_s6, 512, %s1133_s8, %s1117_s19  }
 0x3f0 PF: > { %s1144_s25 = sand.u32 1, %s1861_s15   ;;  %p2609_p12 = scmp.ge.s32.totalorder %s1873_s18, 2 }
 0x3f1   : > { %s1145_s27 = scalar_lea.sflag [#allocation4], %s1144_s25 }
 0x3f2   : > { %p1305_p13 = pnand %p2609_p12, %p1951_p6 }
 0x3f4   : > { %p1306_p0 = pneg %p1305_p13 }
 0x3f6   : > { %1856 = dma.done.wait (%p1306_p0), %s1145_s27, 512  }
 0x3f7   : > { %1858 = vsyncadd (%p1306_p0), %s1145_s27, 4294966784  ;;  %p19_p5 = scmp.ge.s32.totalorder %s1975_s13, 4   ;;  %s2610_s15 = smov %s1865_s16 }
 0x3f8   : > { %s2611_s16 = smov %s1869_s17  ;;  %s2612_s17 = smov %s1984_s23 }
 0x3f9   : > { %s2613_s18 = smov %s1975_s13  ;;  %21 = sbr.rel (!%p19_p5) target bundleno = 7 (0x7), region = 93 }
 0x3fe   :  { %1151 = vsyncpa [#allocation3], 1 }
 0x3ff   :  { %1153 = vsyncpa [#allocation3 + $0x1], 1 }
 0x400   :  { %1154 = vsyncpa [#allocation6], 1 }
 0x401   :  { %1155 = vsyncpa [#allocation9], 1 }
 0x402   :  { %1156 = vsyncpa [#allocation4], 1 }
 0x403   :  { %1158 = vsyncpa [#allocation4 + $0x1], 1 }

</bundles_post_ra>
